<compile_context>
chip_gen: v7x
topology: tpu7x:2x2x1
jax: 0.10.0
libtpu: 0.0.40
codegen_flags: <defaults>
</compile_context>

<pallas_src>
import functools

import jax
import jax.numpy as jnp
from jax.experimental import pallas as pl
from jax.experimental.pallas import tpu as pltpu


def _round_up(n, m):
    return ((n + m - 1) // m) * m


def _fused_mlp_kernel(x_ref, *refs, num_hidden):
    """refs = (w0, b0, ..., w_{H-1}, b_{H-1}, w_last_row, b_last, o_ref)."""
    *param_refs, o_ref = refs
    h = x_ref[...]
    for i in range(num_hidden):
        w = param_refs[2 * i][...]          # bf16 (din_i, dout_i_padded)
        b = param_refs[2 * i + 1][...]      # f32  (1, dout_i_padded)
        h = jnp.dot(h.astype(w.dtype), w, preferred_element_type=jnp.float32)
        h = jnp.maximum(h + b, 0.0)         # bias + ReLU in f32 (VPU)
    w_last = param_refs[2 * num_hidden][...]       # f32 (1, d_last_padded)
    b_last = param_refs[2 * num_hidden + 1][...]   # f32 (1, 1)
    # Final (hidden -> 1) layer as multiply + lane reduction: avoids a padded
    # 128-wide MXU pass and produces a narrow 1-lane result directly.
    out = jnp.sum(h.astype(jnp.float32) * w_last, axis=-1, keepdims=True) + b_last
    o_ref[...] = out.astype(o_ref.dtype)


def init_params(key, input_size, layer_sizes):
    """(W, b) per layer; W is (in, out) — transpose of PyTorch nn.Linear."""
    sizes = [input_size] + list(layer_sizes) + [1]
    params = []
    for din, dout in zip(sizes[:-1], sizes[1:]):
        key, kw, kb = jax.random.split(key, 3)
        bound = 1.0 / jnp.sqrt(din)          # PyTorch default uniform init bound
        w = jax.random.uniform(kw, (din, dout), jnp.float32, -bound, bound)
        b = jax.random.uniform(kb, (dout,), jnp.float32, -bound, bound)
        params.append((w, b))
    return params


def pad_params(params, weight_dtype=jnp.bfloat16):
    """Prepare parameters for the fused kernel.

    Hidden-layer weights: output dim zero-padded to a multiple of 128 and cast
    to bf16 (native MXU dtype); input dim padded only to match the previous
    layer's padded output (the raw input dim is never padded).  Biases stay
    f32 rows (1, dout_p).  The final layer becomes a (1, d_last_p) f32 row
    vector + (1, 1) f32 bias for the multiply+reduce epilogue.  All padding is
    zeros, so the math is exact.
    """
    *hidden, (w_last, b_last) = params
    prepared = []
    prev_pad = None  # padded size of previous layer's output (None => raw input)
    for w, b in hidden:
        din, dout = w.shape
        din_p = din if prev_pad is None else prev_pad
        dout_p = _round_up(dout, 128)
        w_p = jnp.zeros((din_p, dout_p), weight_dtype)
        w_p = w_p.at[:din, :dout].set(w.astype(weight_dtype))
        b_p = jnp.zeros((1, dout_p), jnp.float32).at[0, :dout].set(
            b.astype(jnp.float32))
        prepared.append((w_p, b_p))
        prev_pad = dout_p
    din, dout = w_last.shape
    assert dout == 1
    din_p = din if prev_pad is None else prev_pad
    w_last_p = jnp.zeros((1, din_p), jnp.float32).at[0, :din].set(
        w_last[:, 0].astype(jnp.float32))
    b_last_p = b_last.astype(jnp.float32).reshape(1, 1)
    prepared.append((w_last_p, b_last_p))
    return prepared


def _choose_block_b(B, per_row_bytes, resident_bytes, vmem_budget):
    """Biggest batch tile that fits the VMEM budget, aligned for the MXU."""
    b_aligned = _round_up(B, 8)
    cap = max(8, (vmem_budget - resident_bytes) // max(per_row_bytes, 1))
    tile = min(2048, b_aligned, cap)
    if B >= 512 and tile >= 256:
        # >=2 grid steps so the "parallel" batch axis uses both v7x TCs,
        # 256-row alignment for the 256x256 MXUs on v6e/v7x.
        half = -(-B // 2)
        tile = min(tile, _round_up(half, 256))
        tile = (tile // 256) * 256
    tile = max(8, (tile // 8) * 8)
    return int(tile)


def binary_classifier_forward(x, prepared_params, *, block_b=None):
    """Single fused Pallas kernel for the whole MLP. Returns (batch, 1)."""
    B, din = x.shape
    *hidden_params, (w_last, b_last) = prepared_params
    num_hidden = len(hidden_params)
    if num_hidden:
        assert hidden_params[0][0].shape[0] == din
    else:
        assert w_last.shape[1] == din

    # VMEM accounting: resident weights (double-buffered by BlockSpec) +
    # per-row bytes of the batch tile (in/out double-buffers + live f32 acts).
    resident_bytes = 0
    for w, b in prepared_params:
        resident_bytes += w.size * w.dtype.itemsize + b.size * b.dtype.itemsize
    resident_bytes *= 2
    widest = max([din] + [w.shape[1] for w, _ in prepared_params])
    per_row_bytes = (2 * din * x.dtype.itemsize   # double-buffered input tile
                     + 2 * 1 * 4                  # double-buffered output tile
                     + 3 * widest * 4)            # live f32 activations (fudge)
    vmem_budget = 48 << 20                        # conservative for v7x (64 MiB/TC)

    if block_b is None:
        block_b = _choose_block_b(B, per_row_bytes, resident_bytes, vmem_budget)
    else:
        block_b = max(8, _round_up(min(block_b, _round_up(B, 8)), 8))

    b_p = _round_up(B, block_b)
    nb = b_p // block_b

    # Pad batch rows only when needed (no extra HBM pass in the aligned case).
    if b_p == B:
        x_p = x
    else:
        x_p = jnp.zeros((b_p, din), x.dtype).at[:B, :].set(x)

    flat_params = []
    in_specs = [pl.BlockSpec((block_b, din), lambda i: (i, 0))]
    for w, b in prepared_params:
        flat_params += [w, b]
        # Weights/biases resident across batch tiles (index map ignores i).
        in_specs.append(pl.BlockSpec(w.shape, lambda i: (0, 0)))
        in_specs.append(pl.BlockSpec(b.shape, lambda i: (0, 0)))

    flops = 0
    for w, _ in hidden_params:
        flops += 2 * b_p * w.shape[0] * w.shape[1]
    flops += 2 * b_p * w_last.shape[1]
    bytes_accessed = (x_p.size * x_p.dtype.itemsize
                      + sum(w.size * w.dtype.itemsize + b.size * b.dtype.itemsize
                            for w, b in prepared_params)
                      + b_p * x.dtype.itemsize)
    cost = pl.CostEstimate(flops=flops, transcendentals=0,
                           bytes_accessed=bytes_accessed)

    vmem_estimate = resident_bytes + per_row_bytes * block_b + (4 << 20)
    vmem_limit = int(min(64 << 20, max(vmem_estimate, 32 << 20)))

    kernel = functools.partial(_fused_mlp_kernel, num_hidden=num_hidden)
    out_p = pl.pallas_call(
        kernel,
        out_shape=jax.ShapeDtypeStruct((b_p, 1), x.dtype),
        grid=(nb,),
        in_specs=in_specs,
        out_specs=pl.BlockSpec((block_b, 1), lambda i: (i, 0)),
        compiler_params=pltpu.CompilerParams(
            dimension_semantics=("parallel",),
            vmem_limit_bytes=vmem_limit),
        cost_estimate=cost,
    )(x_p, *flat_params)

    return out_p[:B] if b_p != B else out_p


if __name__ == "__main__":
    key = jax.random.PRNGKey(0)
    batch = 8
    input_size = 32
    layer_sizes = [64, 32]

    kx, kp = jax.random.split(key)
    x = jax.random.normal(kx, (batch, input_size), jnp.float32)
    params = init_params(kp, input_size, layer_sizes)
    prepared = pad_params(params)        # bf16 weights, f32 biases / last layer

    out = binary_classifier_forward(x, prepared)
    out = jax.block_until_ready(out)

    # Reference in plain f32 JAX with the *unpadded* parameters.
    ref = x
    for i, (w, b) in enumerate(params):
        ref = ref @ w + b
        if i < len(params) - 1:
            ref = jnp.maximum(ref, 0.0)

    assert out.shape == (batch, 1), out.shape
    # bf16 MXU weights/activations -> looser tolerance than pure f32.
    assert jnp.allclose(out, ref, atol=5e-2, rtol=5e-2), (out, ref)

    print("KERNEL_OK")
</pallas_src>

<mosaic_0001>
module attributes {stable_mosaic.version = 11 : i64} {
  func.func @_fused_mlp_kernel(%arg0: i32, %arg1: memref<8x32xf32, #tpu.memory_space<vmem>>, %arg2: memref<32x128xbf16, #tpu.memory_space<vmem>>, %arg3: memref<1x128xf32, #tpu.memory_space<vmem>>, %arg4: memref<128x128xbf16, #tpu.memory_space<vmem>>, %arg5: memref<1x128xf32, #tpu.memory_space<vmem>>, %arg6: memref<1x128xf32, #tpu.memory_space<vmem>>, %arg7: memref<1x1xf32, #tpu.memory_space<vmem>>, %arg8: memref<8x1xf32, #tpu.memory_space<vmem>>) attributes {dimension_semantics = [#tpu.dimension_semantics<parallel>], iteration_bounds = array<i64: 1>, scalar_prefetch = 0 : i64, scratch_operands = 0 : i64, tpu.core_type = #tpu.core_type<tc>, window_params = [{transform_indices = @transform_0, window_bounds = array<i64: 8, 32>}, {pipeline_mode = #tpu.pipeline_mode<synchronous>, transform_indices = @transform_1, window_bounds = array<i64: 32, 128>}, {pipeline_mode = #tpu.pipeline_mode<synchronous>, transform_indices = @transform_2, window_bounds = array<i64: 1, 128>}, {pipeline_mode = #tpu.pipeline_mode<synchronous>, transform_indices = @transform_3, window_bounds = array<i64: 128, 128>}, {pipeline_mode = #tpu.pipeline_mode<synchronous>, transform_indices = @transform_4, window_bounds = array<i64: 1, 128>}, {pipeline_mode = #tpu.pipeline_mode<synchronous>, transform_indices = @transform_5, window_bounds = array<i64: 1, 128>}, {pipeline_mode = #tpu.pipeline_mode<synchronous>, transform_indices = @transform_6, window_bounds = array<i64: 1, 1>}, {transform_indices = @transform_7, window_bounds = array<i64: 8, 1>}]} {
    %c0 = arith.constant 0 : index
    %c0_0 = arith.constant 0 : index
    %0 = vector.load %arg1[%c0, %c0_0] : memref<8x32xf32, #tpu.memory_space<vmem>>, vector<8x32xf32>
    %c0_1 = arith.constant 0 : index
    %c0_2 = arith.constant 0 : index
    %1 = vector.load %arg2[%c0_1, %c0_2] : memref<32x128xbf16, #tpu.memory_space<vmem>>, vector<32x128xbf16>
    %c0_3 = arith.constant 0 : index
    %c0_4 = arith.constant 0 : index
    %2 = vector.load %arg3[%c0_3, %c0_4] : memref<1x128xf32, #tpu.memory_space<vmem>>, vector<1x128xf32>
    %3 = arith.truncf %0 : vector<8x32xf32> to vector<8x32xbf16>
    %cst = arith.constant dense<0.000000e+00> : vector<8x128xf32>
    %4 = tpu.matmul %3, %1, %cst {dimension_numbers = #tpu.dot_dimension_numbers<[1], [0], [0], [1], [0, 0, 1, 1], [], []>} : vector<8x32xbf16>, vector<32x128xbf16>, vector<8x128xf32> -> vector<8x128xf32>
    %5 = vector.broadcast %2 : vector<1x128xf32> to vector<8x128xf32>
    %6 = arith.addf %4, %5 : vector<8x128xf32>
    %cst_5 = arith.constant 0.000000e+00 : f32
    %7 = vector.broadcast %cst_5 : f32 to vector<8x128xf32>
    %8 = arith.maximumf %6, %7 : vector<8x128xf32>
    %c0_6 = arith.constant 0 : index
    %c0_7 = arith.constant 0 : index
    %9 = vector.load %arg4[%c0_6, %c0_7] : memref<128x128xbf16, #tpu.memory_space<vmem>>, vector<128x128xbf16>
    %c0_8 = arith.constant 0 : index
    %c0_9 = arith.constant 0 : index
    %10 = vector.load %arg5[%c0_8, %c0_9] : memref<1x128xf32, #tpu.memory_space<vmem>>, vector<1x128xf32>
    %11 = arith.truncf %8 : vector<8x128xf32> to vector<8x128xbf16>
    %cst_10 = arith.constant dense<0.000000e+00> : vector<8x128xf32>
    %12 = tpu.matmul %11, %9, %cst_10 {dimension_numbers = #tpu.dot_dimension_numbers<[1], [0], [0], [1], [0, 0, 1, 1], [], []>} : vector<8x128xbf16>, vector<128x128xbf16>, vector<8x128xf32> -> vector<8x128xf32>
    %13 = vector.broadcast %10 : vector<1x128xf32> to vector<8x128xf32>
    %14 = arith.addf %12, %13 : vector<8x128xf32>
    %cst_11 = arith.constant 0.000000e+00 : f32
    %15 = vector.broadcast %cst_11 : f32 to vector<8x128xf32>
    %16 = arith.maximumf %14, %15 : vector<8x128xf32>
    %c0_12 = arith.constant 0 : index
    %c0_13 = arith.constant 0 : index
    %17 = vector.load %arg6[%c0_12, %c0_13] : memref<1x128xf32, #tpu.memory_space<vmem>>, vector<1x128xf32>
    %c0_14 = arith.constant 0 : index
    %c0_15 = arith.constant 0 : index
    %18 = vector.load %arg7[%c0_14, %c0_15] : memref<1x1xf32, #tpu.memory_space<vmem>>, vector<1x1xf32>
    %19 = vector.broadcast %17 : vector<1x128xf32> to vector<8x128xf32>
    %20 = arith.mulf %16, %19 : vector<8x128xf32>
    %cst_16 = arith.constant dense<0.000000e+00> : vector<8xf32>
    %21 = vector.multi_reduction <add>, %20, %cst_16 [1] : vector<8x128xf32> to vector<8xf32>
    %22 = vector.shape_cast %21 : vector<8xf32> to vector<8x1xf32>
    %23 = vector.broadcast %18 : vector<1x1xf32> to vector<8x1xf32>
    %24 = arith.addf %22, %23 : vector<8x1xf32>
    %c0_17 = arith.constant 0 : index
    %c0_18 = arith.constant 0 : index
    %25 = vector.load %arg8[%c0_17, %c0_18] : memref<8x1xf32, #tpu.memory_space<vmem>>, vector<8x1xf32>
    tpu.vector_store %arg8[%c0_17, %c0_18], %24 {strides = array<i32>} : memref<8x1xf32, #tpu.memory_space<vmem>>, vector<8x1xf32>,
    return
  }
  func.func @transform_0(%arg0: i32) -> (i32, i32) {
    %c0_i32 = arith.constant 0 : i32
    %c0_i32_0 = arith.constant 0 : i32
    return %arg0, %c0_i32 : i32, i32
  }
  func.func @transform_1(%arg0: i32) -> (i32, i32) {
    %c0_i32 = arith.constant 0 : i32
    %c0_i32_0 = arith.constant 0 : i32
    %c0_i32_1 = arith.constant 0 : i32
    return %c0_i32, %c0_i32_0 : i32, i32
  }
  func.func @transform_2(%arg0: i32) -> (i32, i32) {
    %c0_i32 = arith.constant 0 : i32
    %c0_i32_0 = arith.constant 0 : i32
    %c0_i32_1 = arith.constant 0 : i32
    return %c0_i32, %c0_i32_0 : i32, i32
  }
  func.func @transform_3(%arg0: i32) -> (i32, i32) {
    %c0_i32 = arith.constant 0 : i32
    %c0_i32_0 = arith.constant 0 : i32
    %c0_i32_1 = arith.constant 0 : i32
    return %c0_i32, %c0_i32_0 : i32, i32
  }
  func.func @transform_4(%arg0: i32) -> (i32, i32) {
    %c0_i32 = arith.constant 0 : i32
    %c0_i32_0 = arith.constant 0 : i32
    %c0_i32_1 = arith.constant 0 : i32
    return %c0_i32, %c0_i32_0 : i32, i32
  }
  func.func @transform_5(%arg0: i32) -> (i32, i32) {
    %c0_i32 = arith.constant 0 : i32
    %c0_i32_0 = arith.constant 0 : i32
    %c0_i32_1 = arith.constant 0 : i32
    return %c0_i32, %c0_i32_0 : i32, i32
  }
  func.func @transform_6(%arg0: i32) -> (i32, i32) {
    %c0_i32 = arith.constant 0 : i32
    %c0_i32_0 = arith.constant 0 : i32
    %c0_i32_1 = arith.constant 0 : i32
    return %c0_i32, %c0_i32_0 : i32, i32
  }
  func.func @transform_7(%arg0: i32) -> (i32, i32) {
    %c0_i32 = arith.constant 0 : i32
    %c0_i32_0 = arith.constant 0 : i32
    return %arg0, %c0_i32 : i32, i32
  }
}

</mosaic_0001>

<bundles_post_ra>
// kernel: tpu_custom_call.1
= control target key start
LH: loop header
LB: loop body
LE: loop exit
PB: predicated region body
PF: predicated region fallthrough
CT: control target
= control target key end

     0   :  { %s523_s0 = inlined_call_operand.hbm [shape: f32[8,32], index: 0, kind: input, shape index: {}]   ;;  %s524_s1 = inlined_call_operand.hbm [shape: bf16[32,128], index: 1, kind: input, shape index: {}]   ;;  %s525_s2 = inlined_call_operand.vmem [shape: f32[1,128], index: 2, kind: input, shape index: {}]   ;;  %s526_s3 = inlined_call_operand.hbm [shape: bf16[128,128], index: 3, kind: input, shape index: {}]   ;;  %s527_s4 = inlined_call_operand.vmem [shape: f32[1,128], index: 4, kind: input, shape index: {}]   ;;  %s528_s5 = inlined_call_operand.vmem [shape: f32[1,128], index: 5, kind: input, shape index: {}]   ;;  %s529_s6 = inlined_call_operand.<no memory space> [shape: f32[1,1], index: 6, kind: input, shape index: {}]   ;;  %s530_s7 = inlined_call_operand.vmem [shape: f32[8,1], index: 7, kind: output, shape index: {}]  }
   0x1   :  { %v12_v0 = vstv %s529_s6 }
   0x2   :  { %13 = vst [vmem:[#allocation2] sm:$0x1] %v12_v0 }
   0x3   :  { %14 = vsyncpa [#allocation4], 0 }
   0x4   :  { %15 = vsyncpa [#allocation6], 0  ;;  %s419_s26 = smov [#allocation5]   ;;  %s349_s30 = scalar_lea.hbm %s524_s1, 256 }
   0x5   :  { %s31_s27 = sshll.u32 %s419_s26, 4  ;;  %p350_p0 = scmp.ne.s32.totalorder %s524_s1, %s349_s30  ;;  %s32_s27 = int_to_ptr.vmem [resolvable:$true] %s31_s27 }
   0x6   :  { %p353_p1 = scmp.lt.u32.totalorder %s349_s30, %s524_s1 }
   0x8   :  { %p355_p2 = pnand %p353_p1, %p350_p0 }
   0xa   :  { %358 = shalt.err (!%p355_p2)
}
   0xb   :  { %s359_s6 = scalar_lea.vmem %s32_s27, 256  ;;  %p364_p4 = scmp.lt.s32.totalorder %s32_s27, %s32_s27 }
   0xc   :  { %p360_p3 = scmp.ne.s32.totalorder %s32_s27, %s359_s6  ;;  %p365_p5 = scmp.lt.s32.totalorder %s359_s6, %s359_s6 }
   0xe   :  { %p366_p6 = por %p365_p5, %p364_p4 }
  0x10   :  { %p367_p7 = pnand %p366_p6, %p360_p3 }
  0x12   :  { %370 = shalt.err (!%p367_p7)
}
  0x13   :  { %s420_s12 = smov 64   ;;  %s421_s13 = smov 4  }
  0x14   :  { %37 = dma.hbm_to_vmem [thread:$0]  %s524_s1, 256, %s32_s27, [#allocation6], %s420_s12, %s420_s12, %s421_s13  }
  0x15   :  { %s422_s16 = smov [#allocation3]   ;;  %s423_s18 = smov [#allocation7]  }
  0x16   :  { %s22_s17 = sshll.u32 %s422_s16, 4  ;;  %s45_s19 = sshll.u32 %s423_s18, 4  ;;  %s23_s17 = int_to_ptr.vmem [resolvable:$true] %s22_s17  ;;  %s46_s19 = int_to_ptr.vmem [resolvable:$true] %s45_s19 }
  0x17   :  { %s371_s22 = scalar_lea.hbm %s523_s0, 128 }
  0x18   :  { %p372_p8 = scmp.ne.s32.totalorder %s523_s0, %s371_s22  ;;  %p375_p9 = scmp.lt.u32.totalorder %s371_s22, %s523_s0 }
  0x1a   :  { %p377_p10 = pnand %p375_p9, %p372_p8 }
  0x1c   :  { %380 = shalt.err (!%p377_p10)
}
  0x1d   :  { %s381_s1 = scalar_lea.vmem %s23_s17, 128  ;;  %p386_p12 = scmp.lt.s32.totalorder %s23_s17, %s23_s17 }
  0x1e   :  { %p382_p11 = scmp.ne.s32.totalorder %s23_s17, %s381_s1  ;;  %p387_p13 = scmp.lt.s32.totalorder %s381_s1, %s381_s1 }
  0x20   :  { %p388_p0 = por %p387_p13, %p386_p12 }
  0x22   :  { %p389_p1 = pnand %p388_p0, %p382_p11 }
  0x24   :  { %392 = shalt.err (!%p389_p1)
}
  0x25   :  { %25 = dma.hbm_to_vmem [thread:$0]  %s523_s0, 128, %s23_s17, [#allocation4]  }
  0x26   :  { %s393_s8 = scalar_lea.hbm %s526_s3, 1024 }
  0x27   :  { %p394_p2 = scmp.ne.s32.totalorder %s526_s3, %s393_s8  ;;  %p397_p3 = scmp.lt.u32.totalorder %s393_s8, %s526_s3 }
  0x29   :  { %p399_p4 = pnand %p397_p3, %p394_p2 }
  0x2b   :  { %402 = shalt.err (!%p399_p4)
}
  0x2c   :  { %s403_s14 = scalar_lea.vmem %s46_s19, 1024  ;;  %p408_p6 = scmp.lt.s32.totalorder %s46_s19, %s46_s19 }
  0x2d   :  { %p404_p5 = scmp.ne.s32.totalorder %s46_s19, %s403_s14  ;;  %p409_p7 = scmp.lt.s32.totalorder %s403_s14, %s403_s14 }
  0x2f   :  { %p410_p8 = por %p409_p7, %p408_p6 }
  0x31   :  { %p411_p9 = pnand %p410_p8, %p404_p5 }
  0x33   :  { %414 = shalt.err (!%p411_p9)
}
  0x34   :  { %51 = dma.hbm_to_vmem [thread:$0]  %s526_s3, 1024, %s46_s19, [#allocation6], %s420_s12, %s420_s12, %s421_s13  }
  0x35   :  { %415 = dma.done.wait [#allocation4], 128  }
  0x36   :  { %416 = vsyncadd [#allocation4], 4294967168 }
  0x37   :  { %417 = dma.done.wait [#allocation6], 1280  }
  0x38   :  { %418 = vsyncadd [#allocation6], 4294966016  ;;  %v424_v1 = vmov 0.0   ;;  %vm425_vm0 = vmmov 0   ;;  %v339_v2 = vld [vmem:[#allocation5] sm:$0xff]   ;;  %v340_v3 = vld [vmem:[#allocation5 + $0x8] sm:$0xff]  }
  0x39   :  { %304 = vmatprep.subr.bf16.mxu0 %v424_v1  ;;  %308 = vmatprep.mubr.msk.bf16.mxu0 %vm425_vm0, %v424_v1  ;;  %v68_v4 = vld [vmem:[#allocation3] sm:$0xff]  ;;  %v341_v5 = vld [vmem:[#allocation7] sm:$0xff]   ;;  %vm93_vm1 = vcmask 261120   ;;  %v343_v8 = vld [vmem:[#allocation7 + $0x10] sm:$0xff]   ;;  %vm269_vm2 = vcmask 7168  }
  0x3a   :  { %312 = vmatprep.subr.bf16.mxu1 %v424_v1  ;;  %328 = vmatprep.mubr.msk.bf16.mxu1 %vm425_vm0, %v424_v1  ;;  %v74_v6 = vpack.c.bf16 %v68_v4, %v68_v4  ;;  %v342_v7 = vld [vmem:[#allocation7 + $0x8] sm:$0xff]   ;;  %v344_v9 = vld [vmem:[#allocation7 + $0x18] sm:$0xff]   ;;  %v345_v10 = vld [vmem:[#allocation7 + $0x20] sm:$0xff]  }
  0x3b   :  { %305 = vmatpush3.bf16.msra.mxu0 %v339_v2  ;;  %313 = vmatpush3.bf16.msra.mxu1 %v341_v5  ;;  %v346_v11 = vld [vmem:[#allocation7 + $0x28] sm:$0xff]   ;;  %v347_v12 = vld [vmem:[#allocation7 + $0x30] sm:$0xff]   ;;  %v348_v13 = vld [vmem:[#allocation7 + $0x38] sm:$0xff]  }
  0x3c   :  { %306 = vmatprep.subr.bf16.mxu0 %v424_v1  ;;  %314 = vmatprep.subr.bf16.mxu1 %v424_v1  ;;  %v277_v14 = vld [vmem:[%s525_s2] ss:$0 sm:$0xff] }
  0x3d   :  { %v281_v22 = vld [vmem:[%s527_s4] ss:$0 sm:$0xff] }
  0x3e   :  { %v290_v27 = vld [vmem:[%s528_s5] ss:$0 sm:$0xff] }
  0x3f   :  { %307 = vmatpush3.bf16.msra.mxu0 %v340_v3  ;;  %315 = vmatpush3.bf16.msra.mxu1 %v342_v7  ;;  %v291_v31 = vld [vmem:[#allocation2] ss:$0 sm:$0xff] }
  0x40   :  { %316 = vmatprep.subr.bf16.mxu1 %v424_v1 }
  0x42   :  { %309 = vmatmul.mubr.msk.bf16.vlgmr.msra.gmra.mrb[0].mxu0 %vm93_vm1, %v74_v6 }
  0x43   :  { %317 = vmatpush3.bf16.msra.mxu1 %v343_v8 }
  0x44   :  { %318 = vmatprep.subr.bf16.mxu1 %v424_v1 }
  0x47   :  { %319 = vmatpush3.bf16.msra.mxu1 %v344_v9 }
  0x48   :  { %320 = vmatprep.subr.bf16.mxu1 %v424_v1 }
  0x4b   :  { %321 = vmatpush3.bf16.msra.mxu1 %v345_v10 }
  0x4c   :  { %322 = vmatprep.subr.bf16.mxu1 %v424_v1 }
  0x4f   :  { %323 = vmatpush3.bf16.msra.mxu1 %v346_v11 }
  0x50   :  { %324 = vmatprep.subr.bf16.mxu1 %v424_v1 }
  0x53   :  { %325 = vmatpush3.bf16.msra.mxu1 %v347_v12 }
  0x54   :  { %326 = vmatprep.subr.bf16.mxu1 %v424_v1 }
  0x57   :  { %327 = vmatpush3.bf16.msra.mxu1 %v348_v13 }
 0x115   :  { %v131_v15 = vpop.f32.mrb[0].mxu0 }
 0x116   :  { %v132_v16 = vadd.f32 %v277_v14, %v131_v15  ;;  %v310_v17 = vpop.f32.mrb[1].mxu0 }
 0x117   :  { %v134_v18 = vpop.f32.mrb[2].mxu0 }
 0x118   :  { %v137_v19 = vmax.f32 %v132_v16, 0.0  ;;  %v311_v20 = vpop.f32.mrb[3].mxu0 }
 0x11a   :  { %v155_v21 = vpack.c.bf16 %v137_v19, %v137_v19 }
 0x11c   :  { %329 = vmatmul.mubr.bf16.vlgmr.msra.gmra.mrb[0].mxu1 %v155_v21 }
 0x1ef   :  { %v244_v23 = vpop.f32.mrb[0].mxu1 }
 0x1f0   :  { %v245_v24 = vadd.f32 %v281_v22, %v244_v23  ;;  %v330_v25 = vpop.f32.mrb[1].mxu1 }
 0x1f1   :  { %v247_v26 = vpop.f32.mrb[2].mxu1 }
 0x1f2   :  { %v250_v28 = vmax.f32 %v245_v24, 0.0  ;;  %v331_v29 = vpop.f32.mrb[3].mxu1 }
 0x1f4   :  { %v259_v30 = vmul.f32 %v290_v27, %v250_v28 }
 0x1f6   :  { %260 = vadd.xlane.f32.xlu0 %v259_v30 }
 0x283   :  { %v261_v32 = vpop.xlane.xlu0 %260 }
 0x284   :  { %v268_v33 = vadd.f32 %v291_v31, %v261_v32 }
 0x286   :  { %270 = vst.msk [vmem:[%s530_s7] sm:$0xff] %vm269_vm2, %v268_v33 }
 0x287   :  { %275 = vsyncpa [#allocation4], 1 }
 0x288   :  { %276 = vsyncpa [#allocation6], 1 }

</bundles_post_ra>
